<compile_context>
chip_gen: v7x
topology: tpu7x:2x2x1
jax: 0.10.0
libtpu: 0.0.40
codegen_flags: <defaults>
</compile_context>

<pallas_src>
import jax
import jax.numpy as jnp
from jax.experimental import pallas as pl
from jax.experimental.pallas import tpu as pltpu


def mlp_kernel(x_ref, w1_ref, b1_ref, w2_ref, b2_ref, o_ref):
    # Cast the activation tile to the matmul operand dtype in-kernel (keeps the
    # HBM stream at the caller's dtype; cast is a cheap VPU pass).
    x = x_ref[...].astype(w1_ref.dtype)
    # fc1 with BN folded in: (tn, D) @ (D, Hp) -> (tn, Hp), f32 MXU accumulation.
    h = jnp.dot(x, w1_ref[...], preferred_element_type=jnp.float32)
    # bias + ReLU in f32 (safe on v5e: no bf16 VALU).  Dropout = identity (eval).
    h = jnp.maximum(h + b1_ref[...], 0.0)
    # classifier: (tn, Hp) @ (Hp, Cp) -> (tn, Cp); operands in compute dtype,
    # f32 accumulation.
    o = jnp.dot(h.astype(w2_ref.dtype), w2_ref[...],
                preferred_element_type=jnp.float32)
    o_ref[...] = (o + b2_ref[...]).astype(o_ref.dtype)


def _round_up(v, m):
    return ((v + m - 1) // m) * m


def _const_spec(shape):
    """BlockSpec for a grid-invariant operand; single-buffered when supported."""
    index_map = lambda i: (0,) * len(shape)
    try:
        return pl.BlockSpec(shape, index_map, pipeline_mode=pl.Buffered(1))
    except (TypeError, ValueError):
        # Older jax without pipeline_mode / Buffered(1): fall back to default.
        return pl.BlockSpec(shape, index_map)


def mlp_layer(x, w1, b1, bn_scale, bn_shift, w2, b2, *, tn=None,
              compute_dtype=jnp.bfloat16):
    """x: (B, L, D); w1: (D, H); w2: (H, C); bn_*: per-hidden-channel (H,).

    compute_dtype: dtype of the MXU operands (default bf16; accumulation and
    the elementwise epilogue are always f32).  Pass jnp.float32 for a strict
    f32 path.
    """
    B, L, D = x.shape
    H = w1.shape[1]
    C = w2.shape[1]
    N = B * L

    # ---- Fold BatchNorm1d (eval, running stats) + fc1 bias into fc1. ----
    w1f = w1.astype(jnp.float32) * bn_scale.astype(jnp.float32)[None, :]
    b1f = (b1.astype(jnp.float32) * bn_scale.astype(jnp.float32)
           + bn_shift.astype(jnp.float32))

    # ---- Pad only weight/bias lane dims to 128 (x's D is NOT padded). ----
    Hp = _round_up(H, 128)
    Cp = _round_up(C, 128)
    w2p = w2.astype(jnp.float32)
    b2p = b2.astype(jnp.float32)
    if Hp != H:
        w1f = jnp.pad(w1f, ((0, 0), (0, Hp - H)))
        b1f = jnp.pad(b1f, (0, Hp - H))
        w2p = jnp.pad(w2p, ((0, Hp - H), (0, 0)))
    if Cp != C:
        w2p = jnp.pad(w2p, ((0, 0), (0, Cp - C)))
        b2p = jnp.pad(b2p, (0, Cp - C))

    cdt = jnp.dtype(compute_dtype) if compute_dtype is not None else jnp.dtype(
        jnp.float32)
    w1f = w1f.astype(cdt)
    w2p = w2p.astype(cdt)

    # ---- Row-tile selection. ----
    # bf16 packs 2 rows per sublane -> tile rows must be a multiple of 16.
    row_align = 8 if cdt.itemsize >= 4 else (16 if cdt.itemsize == 2 else 32)
    xf = x.reshape(N, D)
    if tn is None:
        divs = [t for t in range(row_align, min(N, 256) + 1, row_align)
                if N % t == 0]
        tn = max(divs) if divs else min(256, _round_up(N, row_align))
    else:
        tn = max(row_align, _round_up(int(tn), row_align))
    Np = _round_up(N, tn)
    if Np != N:
        # Ragged N: pad rows to a tile multiple (padded rows are discarded).
        xf = jnp.pad(xf, ((0, Np - N), (0, 0)))
    grid = (Np // tn,)

    x_bytes = jnp.dtype(xf.dtype).itemsize
    w_bytes = cdt.itemsize
    out_bytes = jnp.dtype(x.dtype).itemsize

    cost = pl.CostEstimate(
        flops=2 * Np * D * Hp + 2 * Np * Hp * Cp,
        transcendentals=0,
        bytes_accessed=(Np * D * x_bytes + D * Hp * w_bytes + Hp * 4
                        + Hp * Cp * w_bytes + Cp * 4 + Np * Cp * out_bytes),
    )

    # Explicit VMEM budget (x/out double-buffered, weights single-buffered,
    # headroom for the f32 intermediates); clamp to [32 MiB, 64 MiB].
    vmem_est = (2 * tn * D * x_bytes + D * Hp * w_bytes + Hp * 4
                + Hp * Cp * w_bytes + Cp * 4 + 2 * tn * Cp * out_bytes
                + tn * Hp * 4 + tn * Cp * 4)
    vmem_limit = int(min(64 << 20, max(32 << 20, vmem_est * 2)))

    out = pl.pallas_call(
        mlp_kernel,
        out_shape=jax.ShapeDtypeStruct((Np, Cp), x.dtype),
        grid_spec=pltpu.PrefetchScalarGridSpec(
            num_scalar_prefetch=0,
            grid=grid,
            in_specs=[
                pl.BlockSpec((tn, D), lambda i: (i, 0)),  # x rows (not padded)
                _const_spec((D, Hp)),                     # folded fc1 weight
                _const_spec((1, Hp)),                     # folded fc1 bias (f32)
                _const_spec((Hp, Cp)),                    # classifier weight
                _const_spec((1, Cp)),                     # classifier bias (f32)
            ],
            out_specs=pl.BlockSpec((tn, Cp), lambda i: (i, 0)),
        ),
        compiler_params=pltpu.CompilerParams(
            dimension_semantics=("parallel",),
            vmem_limit_bytes=vmem_limit),
        cost_estimate=cost,
    )(xf, w1f, b1f.reshape(1, Hp), w2p, b2p.reshape(1, Cp))

    return out[:N, :C].reshape(B, L, C)


def reference(x, w1, b1, scale, shift, w2, b2):
    h = jnp.einsum("bld,dh->blh", x, w1) + b1
    h = h * scale + shift
    h = jnp.maximum(h, 0.0)
    return jnp.einsum("blh,hc->blc", h, w2) + b2


if __name__ == "__main__":
    # Small shapes consistent with the module: input_size=32 -> hidden=64,
    # num_labels=256, batch=2, seq=8.
    B, L, D = 2, 8, 32
    H = D * 2
    C = 256
    eps = 1e-5

    key = jax.random.PRNGKey(0)
    k = jax.random.split(key, 8)

    x = jax.random.normal(k[0], (B, L, D), dtype=jnp.float32)

    w1 = jax.random.normal(k[1], (D, H), dtype=jnp.float32) * (1.0 / jnp.sqrt(D))
    b1 = 0.01 * jax.random.normal(k[2], (H,), dtype=jnp.float32)

    gamma = 1.0 + 0.1 * jax.random.normal(k[3], (H,), dtype=jnp.float32)
    beta = 0.1 * jax.random.normal(k[4], (H,), dtype=jnp.float32)
    running_mean = 0.1 * jax.random.normal(k[5], (H,), dtype=jnp.float32)
    running_var = 0.5 + jnp.abs(jax.random.normal(k[6], (H,), dtype=jnp.float32))

    # BatchNorm1d (eval mode) per-channel scale/shift.
    bn_scale = gamma / jnp.sqrt(running_var + eps)
    bn_shift = beta - running_mean * bn_scale

    w2 = jax.random.normal(k[7], (H, C), dtype=jnp.float32) * (1.0 / jnp.sqrt(H))
    b2 = jnp.zeros((C,), dtype=jnp.float32)

    ref = reference(x, w1, b1, bn_scale, bn_shift, w2, b2)

    # Strict f32 operand path.
    out_f32 = jax.block_until_ready(
        mlp_layer(x, w1, b1, bn_scale, bn_shift, w2, b2,
                  compute_dtype=jnp.float32))
    assert out_f32.shape == (B, L, C)
    assert jnp.allclose(out_f32, ref, atol=1e-4, rtol=1e-4), "f32 mismatch"

    # Default bf16 operand path (f32 accumulation): looser tolerance.
    out_bf16 = jax.block_until_ready(
        mlp_layer(x, w1, b1, bn_scale, bn_shift, w2, b2))
    assert out_bf16.shape == (B, L, C)
    assert jnp.allclose(out_bf16, ref, atol=5e-2, rtol=5e-2), "bf16 mismatch"

    print("KERNEL_OK")
</pallas_src>

<mosaic_0001>
module attributes {stable_mosaic.version = 11 : i64} {
  func.func @mlp_kernel(%arg0: i32, %arg1: memref<16x32xf32, #tpu.memory_space<vmem>>, %arg2: memref<32x128xf32, #tpu.memory_space<vmem>>, %arg3: memref<1x128xf32, #tpu.memory_space<vmem>>, %arg4: memref<128x256xf32, #tpu.memory_space<vmem>>, %arg5: memref<1x256xf32, #tpu.memory_space<vmem>>, %arg6: memref<16x256xf32, #tpu.memory_space<vmem>>) attributes {dimension_semantics = [#tpu.dimension_semantics<parallel>], iteration_bounds = array<i64: 1>, scalar_prefetch = 0 : i64, scratch_operands = 0 : i64, tpu.core_type = #tpu.core_type<tc>, window_params = [{transform_indices = @transform_0, window_bounds = array<i64: 16, 32>}, {pipeline_mode = #tpu.pipeline_mode<synchronous>, transform_indices = @transform_1, window_bounds = array<i64: 32, 128>}, {pipeline_mode = #tpu.pipeline_mode<synchronous>, transform_indices = @transform_2, window_bounds = array<i64: 1, 128>}, {pipeline_mode = #tpu.pipeline_mode<synchronous>, transform_indices = @transform_3, window_bounds = array<i64: 128, 256>}, {pipeline_mode = #tpu.pipeline_mode<synchronous>, transform_indices = @transform_4, window_bounds = array<i64: 1, 256>}, {transform_indices = @transform_5, window_bounds = array<i64: 16, 256>}]} {
    %c0 = arith.constant 0 : index
    %c0_0 = arith.constant 0 : index
    %0 = vector.load %arg1[%c0, %c0_0] : memref<16x32xf32, #tpu.memory_space<vmem>>, vector<16x32xf32>
    %c0_1 = arith.constant 0 : index
    %c0_2 = arith.constant 0 : index
    %1 = vector.load %arg2[%c0_1, %c0_2] : memref<32x128xf32, #tpu.memory_space<vmem>>, vector<32x128xf32>
    %cst = arith.constant dense<0.000000e+00> : vector<16x128xf32>
    %2 = tpu.matmul %0, %1, %cst {dimension_numbers = #tpu.dot_dimension_numbers<[1], [0], [0], [1], [0, 0, 1, 1], [], []>} : vector<16x32xf32>, vector<32x128xf32>, vector<16x128xf32> -> vector<16x128xf32>
    %c0_3 = arith.constant 0 : index
    %c0_4 = arith.constant 0 : index
    %3 = vector.load %arg3[%c0_3, %c0_4] : memref<1x128xf32, #tpu.memory_space<vmem>>, vector<1x128xf32>
    %4 = vector.broadcast %3 : vector<1x128xf32> to vector<16x128xf32>
    %5 = arith.addf %2, %4 : vector<16x128xf32>
    %cst_5 = arith.constant 0.000000e+00 : f32
    %6 = vector.broadcast %cst_5 : f32 to vector<16x128xf32>
    %7 = arith.maximumf %5, %6 : vector<16x128xf32>
    %c0_6 = arith.constant 0 : index
    %c0_7 = arith.constant 0 : index
    %8 = vector.load %arg4[%c0_6, %c0_7] : memref<128x256xf32, #tpu.memory_space<vmem>>, vector<128x256xf32>
    %cst_8 = arith.constant dense<0.000000e+00> : vector<16x256xf32>
    %9 = tpu.matmul %7, %8, %cst_8 {dimension_numbers = #tpu.dot_dimension_numbers<[1], [0], [0], [1], [0, 0, 1, 1], [], []>} : vector<16x128xf32>, vector<128x256xf32>, vector<16x256xf32> -> vector<16x256xf32>
    %c0_9 = arith.constant 0 : index
    %c0_10 = arith.constant 0 : index
    %10 = vector.load %arg5[%c0_9, %c0_10] : memref<1x256xf32, #tpu.memory_space<vmem>>, vector<1x256xf32>
    %11 = vector.broadcast %10 : vector<1x256xf32> to vector<16x256xf32>
    %12 = arith.addf %9, %11 : vector<16x256xf32>
    %c0_11 = arith.constant 0 : index
    %c0_12 = arith.constant 0 : index
    %13 = vector.load %arg6[%c0_11, %c0_12] : memref<16x256xf32, #tpu.memory_space<vmem>>, vector<16x256xf32>
    tpu.vector_store %arg6[%c0_11, %c0_12], %12 {strides = array<i32>} : memref<16x256xf32, #tpu.memory_space<vmem>>, vector<16x256xf32>,
    return
  }
  func.func @transform_0(%arg0: i32) -> (i32, i32) {
    %c0_i32 = arith.constant 0 : i32
    %c0_i32_0 = arith.constant 0 : i32
    return %arg0, %c0_i32 : i32, i32
  }
  func.func @transform_1(%arg0: i32) -> (i32, i32) {
    %c0_i32 = arith.constant 0 : i32
    %c0_i32_0 = arith.constant 0 : i32
    %c0_i32_1 = arith.constant 0 : i32
    return %c0_i32, %c0_i32_0 : i32, i32
  }
  func.func @transform_2(%arg0: i32) -> (i32, i32) {
    %c0_i32 = arith.constant 0 : i32
    %c0_i32_0 = arith.constant 0 : i32
    %c0_i32_1 = arith.constant 0 : i32
    return %c0_i32, %c0_i32_0 : i32, i32
  }
  func.func @transform_3(%arg0: i32) -> (i32, i32) {
    %c0_i32 = arith.constant 0 : i32
    %c0_i32_0 = arith.constant 0 : i32
    %c0_i32_1 = arith.constant 0 : i32
    return %c0_i32, %c0_i32_0 : i32, i32
  }
  func.func @transform_4(%arg0: i32) -> (i32, i32) {
    %c0_i32 = arith.constant 0 : i32
    %c0_i32_0 = arith.constant 0 : i32
    %c0_i32_1 = arith.constant 0 : i32
    return %c0_i32, %c0_i32_0 : i32, i32
  }
  func.func @transform_5(%arg0: i32) -> (i32, i32) {
    %c0_i32 = arith.constant 0 : i32
    %c0_i32_0 = arith.constant 0 : i32
    return %arg0, %c0_i32 : i32, i32
  }
}

</mosaic_0001>

<bundles_post_ra>
// kernel: tpu_custom_call.1
= control target key start
LH: loop header
LB: loop body
LE: loop exit
PB: predicated region body
PF: predicated region fallthrough
CT: control target
= control target key end

     0   :  { %10 = vsyncpa [#allocation3], 0  ;;  %s573_s0 = inlined_call_operand.hbm [shape: f32[16,32], index: 0, kind: input, shape index: {}]   ;;  %s574_s1 = inlined_call_operand.hbm [shape: f32[32,128], index: 1, kind: input, shape index: {}]   ;;  %s575_s2 = inlined_call_operand.vmem [shape: f32[1,128], index: 2, kind: input, shape index: {}]   ;;  %s576_s3 = inlined_call_operand.hbm [shape: f32[128,256], index: 3, kind: input, shape index: {}]   ;;  %s577_s4 = inlined_call_operand.vmem [shape: f32[1,256], index: 4, kind: input, shape index: {}]   ;;  %s578_s5 = inlined_call_operand.hbm [shape: f32[16,256], index: 5, kind: output, shape index: {}]  }
   0x1   :  { %11 = vsyncpa [#allocation6], 0 }
   0x2   :  { %12 = vsyncpa [#allocation4], 0  ;;  %s465_s18 = smov [#allocation5]   ;;  %s466_s20 = smov [#allocation2]  }
   0x3   :  { %s30_s19 = sshll.u32 %s465_s18, 4  ;;  %s18_s21 = sshll.u32 %s466_s20, 4  ;;  %s31_s19 = int_to_ptr.vmem [resolvable:$true] %s30_s19  ;;  %s504_s21 = int_to_ptr.vmem [resolvable:$true] %s18_s21 }
   0x4   :  { %s371_s24 = scalar_lea.hbm %s574_s1, 512 }
   0x5   :  { %p372_p0 = scmp.ne.s32.totalorder %s574_s1, %s371_s24  ;;  %p375_p1 = scmp.lt.u32.totalorder %s371_s24, %s574_s1 }
   0x7   :  { %p377_p2 = pnand %p375_p1, %p372_p0 }
   0x9   :  { %380 = shalt.err (!%p377_p2)
}
   0xa   :  { %s381_s29 = scalar_lea.vmem %s31_s19, 512  ;;  %p386_p4 = scmp.lt.s32.totalorder %s31_s19, %s31_s19 }
   0xb   :  { %p382_p3 = scmp.ne.s32.totalorder %s31_s19, %s381_s29  ;;  %p387_p5 = scmp.lt.s32.totalorder %s381_s29, %s381_s29 }
   0xd   :  { %p388_p6 = por %p387_p5, %p386_p4 }
   0xf   :  { %p389_p7 = pnand %p388_p6, %p382_p3 }
  0x11   :  { %392 = shalt.err (!%p389_p7)
}
  0x12   :  { %s467_s30 = smov 128   ;;  %s468_s6 = smov 8  }
  0x13   :  { %36 = dma.hbm_to_vmem [thread:$0]  %s574_s1, 512, %s31_s19, [#allocation6], %s467_s30, %s467_s30, %s468_s6  }
  0x14   :  { %s393_s11 = scalar_lea.hbm %s573_s0, 256 }
  0x15   :  { %p394_p8 = scmp.ne.s32.totalorder %s573_s0, %s393_s11  ;;  %p397_p9 = scmp.lt.u32.totalorder %s393_s11, %s573_s0 }
  0x17   :  { %p399_p10 = pnand %p397_p9, %p394_p8 }
  0x19   :  { %402 = shalt.err (!%p399_p10)
}
  0x1a   :  { %s403_s16 = scalar_lea.vmem %s504_s21, 256  ;;  %p408_p12 = scmp.lt.s32.totalorder %s504_s21, %s504_s21 }
  0x1b   :  { %p404_p11 = scmp.ne.s32.totalorder %s504_s21, %s403_s16  ;;  %p409_p13 = scmp.lt.s32.totalorder %s403_s16, %s403_s16 }
  0x1d   :  { %p410_p0 = por %p409_p13, %p408_p12 }
  0x1f   :  { %p411_p1 = pnand %p410_p0, %p404_p11 }
  0x21   :  { %414 = shalt.err (!%p411_p1)
}
  0x22   :  { %24 = dma.hbm_to_vmem [thread:$0]  %s573_s0, 256, %s504_s21, [#allocation3], %s467_s30, %s467_s30, %s468_s6  }
  0x23   :  { %s469_s18 = smov [#allocation7]   ;;  %s415_s23 = scalar_lea.hbm %s576_s3, 4096 }
  0x24   :  { %s44_s19 = sshll.u32 %s469_s18, 4  ;;  %p416_p2 = scmp.ne.s32.totalorder %s576_s3, %s415_s23  ;;  %s45_s19 = int_to_ptr.vmem [resolvable:$true] %s44_s19 }
  0x25   :  { %p419_p3 = scmp.lt.u32.totalorder %s415_s23, %s576_s3 }
  0x27   :  { %p421_p4 = pnand %p419_p3, %p416_p2 }
  0x29   :  { %424 = shalt.err (!%p421_p4)
}
  0x2a   :  { %s425_s28 = scalar_lea.vmem %s45_s19, 4096  ;;  %p430_p6 = scmp.lt.s32.totalorder %s45_s19, %s45_s19 }
  0x2b   :  { %p426_p5 = scmp.ne.s32.totalorder %s45_s19, %s425_s28  ;;  %p431_p7 = scmp.lt.s32.totalorder %s425_s28, %s425_s28 }
  0x2d   :  { %p432_p8 = por %p431_p7, %p430_p6 }
  0x2f   :  { %p433_p9 = pnand %p432_p8, %p426_p5 }
  0x31   :  { %436 = shalt.err (!%p433_p9)
}
  0x32   :  { %s470_s0 = smov 256   ;;  %s471_s21 = smov 16  }
  0x33   :  { %50 = dma.hbm_to_vmem [thread:$0]  %s576_s3, 4096, %s45_s19, [#allocation6], %s470_s0, %s470_s0, %s471_s21  }
  0x34   :  { %459 = dma.done.wait [#allocation3], 256  }
  0x35   :  { %460 = vsyncadd [#allocation3], 4294967040 }
  0x36   :  { %461 = dma.done.wait [#allocation6], 4608  }
  0x37   :  { %462 = vsyncadd [#allocation6], 4294962688  ;;  %vm75_vm0 = vcmask 261120   ;;  %v64_v0 = vld [vmem:[#allocation5] sm:$0xff]  ;;  %v65_v1 = vld [vmem:[#allocation5 + $0x8] sm:$0xff]  ;;  %v472_v56 = vmov 0.0  }
  0x38   :  { %v66_v2 = vld [vmem:[#allocation5 + $0x10] sm:$0xff]  ;;  %v322_v3 = vpack.c.bf16 %v65_v1, %v64_v0  ;;  %v67_v4 = vld [vmem:[#allocation5 + $0x18] sm:$0xff]  ;;  %v160_v7 = vld [vmem:[#allocation7 + $0x8] sm:$0xff]  ;;  %267 = vmatprep.mubr.f32.mxu1 %v472_v56  ;;  %v193_v0 = vlaneseq }
  0x39   :  { %v62_v5 = vld [vmem:[#allocation2] sm:$0xff]  ;;  %v326_v6 = vpack.c.bf16 %v67_v4, %v66_v2  ;;  %v162_v8 = vld [vmem:[#allocation7 + $0x18] sm:$0xff]  ;;  %v159_v9 = vld [vmem:[#allocation7] sm:$0xff] }
  0x3a   :  { %319 = vmatprep.mubr.msk.f32.mxu0 %vm75_vm0, %v62_v5  ;;  %323 = vmatprep.subr.bf16.mxu0 %v322_v3  ;;  %v330_v10 = vpack.c.bf16 %v162_v8, %v160_v7  ;;  %v161_v11 = vld [vmem:[#allocation7 + $0x10] sm:$0xff]  ;;  %v164_v12 = vld [vmem:[#allocation7 + $0x28] sm:$0xff]  ;;  %v166_v13 = vld [vmem:[#allocation7 + $0x38] sm:$0xff]  ;;  %v194_v1 = vshrl.u32 %v193_v0, 7 }
  0x3b   :  { %325 = vmatpush3.bf16.msra.mxu0 %v322_v3  ;;  %v332_v14 = vpack.c.bf16 %v161_v11, %v159_v9  ;;  %v334_v15 = vpack.c.bf16 %v166_v13, %v164_v12  ;;  %v163_v16 = vld [vmem:[#allocation7 + $0x20] sm:$0xff]  ;;  %v165_v17 = vld [vmem:[#allocation7 + $0x30] sm:$0xff]  ;;  %v168_v18 = vld [vmem:[#allocation7 + $0x48] sm:$0xff] }
  0x3c   :  { %327 = vmatprep.subr.bf16.mxu0 %v326_v6  ;;  %331 = vmatprep.subr.bf16.mxu1 %v330_v10  ;;  %v170_v19 = vld [vmem:[#allocation7 + $0x58] sm:$0xff]  ;;  %v336_v20 = vpack.c.bf16 %v165_v17, %v163_v16  ;;  %v167_v22 = vld [vmem:[#allocation7 + $0x40] sm:$0xff]  ;;  %v169_v23 = vld [vmem:[#allocation7 + $0x50] sm:$0xff]  ;;  %v195_v2 = vsub.s32 0, %v194_v1  ;;  %v199_v4 = vsub.s32 1, %v194_v1 }
  0x3d   :  { %333 = vmatpush1.bf16.msra.mxu1 %v332_v14  ;;  %v338_v21 = vpack.c.bf16 %v170_v19, %v168_v18  ;;  %v63_v24 = vld [vmem:[#allocation2 + $0x8] sm:$0xff]  ;;  %v172_v25 = vld [vmem:[#allocation7 + $0x68] sm:$0xff]  ;;  %v340_v27 = vpack.c.bf16 %v169_v23, %v167_v22  ;;  %v171_v29 = vld [vmem:[#allocation7 + $0x60] sm:$0xff] }
  0x3e   :  { %335 = vmatprep.subr.bf16.mxu1 %v334_v15  ;;  %v174_v26 = vld [vmem:[#allocation7 + $0x78] sm:$0xff]  ;;  %v173_v30 = vld [vmem:[#allocation7 + $0x70] sm:$0xff]  ;;  %v176_v31 = vld [vmem:[#allocation7 + $0x88] sm:$0xff] }
  0x3f   :  { %329 = vmatpush3.bf16.msra.mxu0 %v326_v6  ;;  %v342_v28 = vpack.c.bf16 %v174_v26, %v172_v25  ;;  %v178_v32 = vld [vmem:[#allocation7 + $0x98] sm:$0xff]  ;;  %v344_v33 = vpack.c.bf16 %v173_v30, %v171_v29  ;;  %v175_v35 = vld [vmem:[#allocation7 + $0x80] sm:$0xff]  ;;  %v177_v36 = vld [vmem:[#allocation7 + $0x90] sm:$0xff] }
  0x40   :  { %v346_v34 = vpack.c.bf16 %v178_v32, %v176_v31  ;;  %v180_v37 = vld [vmem:[#allocation7 + $0xa8] sm:$0xff]  ;;  %v182_v38 = vld [vmem:[#allocation7 + $0xb8] sm:$0xff]  ;;  %v348_v39 = vpack.c.bf16 %v177_v36, %v175_v35  ;;  %v179_v41 = vld [vmem:[#allocation7 + $0xa0] sm:$0xff] }
  0x41   :  { %337 = vmatpush1.bf16.msra.mxu1 %v336_v20  ;;  %v350_v40 = vpack.c.bf16 %v182_v38, %v180_v37  ;;  %v181_v42 = vld [vmem:[#allocation7 + $0xb0] sm:$0xff]  ;;  %v184_v43 = vld [vmem:[#allocation7 + $0xc8] sm:$0xff]  ;;  %v186_v44 = vld [vmem:[#allocation7 + $0xd8] sm:$0xff] }
  0x42   :  { %320 = vmatmul.mubr.msk.f32.vlgmr.msra.gmra.mrb[0].mxu0 %vm75_vm0, %v63_v24  ;;  %339 = vmatprep.subr.bf16.mxu1 %v338_v21  ;;  %v352_v45 = vpack.c.bf16 %v181_v42, %v179_v41  ;;  %v354_v46 = vpack.c.bf16 %v186_v44, %v184_v43  ;;  %v183_v47 = vld [vmem:[#allocation7 + $0xc0] sm:$0xff]  ;;  %v185_v48 = vld [vmem:[#allocation7 + $0xd0] sm:$0xff]  ;;  %v188_v50 = vld [vmem:[#allocation7 + $0xe8] sm:$0xff] }
  0x43   :  { %v356_v49 = vpack.c.bf16 %v185_v48, %v183_v47  ;;  %v190_v51 = vld [vmem:[#allocation7 + $0xf8] sm:$0xff]  ;;  %v187_v53 = vld [vmem:[#allocation7 + $0xe0] sm:$0xff]  ;;  %v189_v54 = vld [vmem:[#allocation7 + $0xf0] sm:$0xff] }
  0x44   :  { %v358_v52 = vpack.c.bf16 %v190_v51, %v188_v50  ;;  %v360_v55 = vpack.c.bf16 %v189_v54, %v187_v53  ;;  %v302_v57 = vld [vmem:[%s575_s2] ss:$0 sm:$0xff]  ;;  %s473_s2 = smov [#allocation8]  }
  0x45   :  { %341 = vmatpush1.bf16.msra.mxu1 %v340_v27  ;;  %v191_v3 = vld [vmem:[%s577_s4] sm:$0x3]  ;;  %s289_s9 = sshll.u32 %s473_s2, 4  ;;  %s290_s9 = int_to_ptr.vmem [resolvable:$true] %s289_s9 }
  0x46   :  { %343 = vmatprep.subr.bf16.mxu1 %v342_v28  ;;  %v196_v5 = vrot.slane %v191_v3, %v195_v2  ;;  %v200_v6 = vrot.slane %v191_v3, %v199_v4  ;;  %s437_s10 = scalar_lea.vmem %s290_s9, 512  ;;  %p442_p11 = scmp.lt.s32.totalorder %s290_s9, %s290_s9 }
  0x47   :  { %p438_p10 = scmp.ne.s32.totalorder %s290_s9, %s437_s10  ;;  %p443_p12 = scmp.lt.s32.totalorder %s437_s10, %s437_s10 }
  0x49   :  { %345 = vmatpush1.bf16.msra.mxu1 %v344_v33  ;;  %p444_p13 = por %p443_p12, %p442_p11 }
  0x4a   :  { %347 = vmatprep.subr.bf16.mxu1 %v346_v34 }
  0x4b   :  { %p445_p0 = pnand %p444_p13, %p438_p10 }
  0x4d   :  { %349 = vmatpush1.bf16.msra.mxu1 %v348_v39 }
  0x4e   :  { %351 = vmatprep.subr.bf16.mxu1 %v350_v40 }
  0x51   :  { %353 = vmatpush1.bf16.msra.mxu1 %v352_v45 }
  0x52   :  { %355 = vmatprep.subr.bf16.mxu1 %v354_v46 }
  0x55   :  { %357 = vmatpush1.bf16.msra.mxu1 %v356_v49 }
  0x56   :  { %359 = vmatprep.subr.bf16.mxu1 %v358_v52 }
  0x59   :  { %361 = vmatpush1.bf16.msra.mxu1 %v360_v55 }
 0x115   :  { %v321_v58 = vpop.f32.mrb[0].mxu0 }
 0x116   :  { %v148_v59 = vpop.f32.mrb[1].mxu0  ;;  %v154_v61 = vadd.f32 %v321_v58, %v302_v57 }
 0x117   :  { %v149_v60 = vadd.f32 %v302_v57, %v148_v59 }
 0x118   :  { %v158_v63 = vmax.f32 %v154_v61, 0.0 }
 0x119   :  { %v157_v62 = vmax.f32 %v149_v60, 0.0 }
 0x11b   :  { %268 = vmatmul.mubr.f32.vlgmr.msra.gmra.mrb[0].mxu1 %v157_v62 }
 0x11c   :  { %273 = vmatprep.mubr.f32.mxu1 %v472_v56 }
 0x11f   :  { %274 = vmatmul.mubr.f32.gmra.mrb[2].mxu1 %v158_v63 }
 0x1ee   :  { %v269_v7 = vpop.f32.mrb[0].mxu1 }
 0x1ef   :  { %v270_v8 = vadd.f32 %v269_v7, %v196_v5  ;;  %v271_v9 = vpop.f32.mrb[1].mxu1 }
 0x1f0   :  { %v272_v10 = vadd.f32 %v271_v9, %v200_v6 }
 0x1f1   :  { %280 = vst [vmem:[#allocation8] sm:$0xff] %v270_v8 }
 0x1f2   :  { %281 = vst [vmem:[#allocation8 + $0x8] sm:$0xff] %v272_v10  ;;  %v275_v11 = vpop.f32.mrb[2].mxu1 }
 0x1f3   :  { %v276_v12 = vadd.f32 %v275_v11, %v196_v5  ;;  %v277_v13 = vpop.f32.mrb[3].mxu1 }
 0x1f4   :  { %v278_v14 = vadd.f32 %v277_v13, %v200_v6 }
 0x1f5   :  { %282 = vst [vmem:[#allocation8 + $0x10] sm:$0xff] %v276_v12 }
 0x1f6   :  { %283 = vst [vmem:[#allocation8 + $0x18] sm:$0xff] %v278_v14 }
 0x1f7   :  { %448 = shalt.err (!%p445_p0)
}
 0x1f8   :  { %s449_s12 = scalar_lea.hbm %s578_s5, 512 }
 0x1f9   :  { %p450_p1 = scmp.ne.s32.totalorder %s578_s5, %s449_s12  ;;  %p453_p2 = scmp.lt.u32.totalorder %s449_s12, %s578_s5 }
 0x1fb   :  { %p455_p3 = pnand %p453_p2, %p450_p1 }
 0x1fd   :  { %458 = shalt.err (!%p455_p3)
}
 0x1fe   :  { %295 = dma.vmem_to_hbm [thread:$0]  %s290_s9, 512, %s578_s5, [#allocation4], %s470_s0, %s470_s0, %s471_s21  }
 0x1ff   :  { %463 = dma.done.wait [#allocation4], 512  }
 0x200   :  { %464 = vsyncadd [#allocation4], 4294966784 }
 0x201   :  { %299 = vsyncpa [#allocation3], 1 }
 0x202   :  { %300 = vsyncpa [#allocation6], 1 }
 0x203   :  { %301 = vsyncpa [#allocation4], 1 }

</bundles_post_ra>
